<compile_context>
chip_gen: v5e
topology: v5e:2x2
jax: 0.10.0
libtpu: 0.0.40
codegen_flags: <defaults>
</compile_context>

<pallas_src>
import jax
import jax.numpy as jnp
from jax.experimental import pallas as pl
from jax.experimental.pallas import tpu as pltpu


def _mlp_kernel(x_ref, w1_ref, b1_ref, w2_ref, b2_ref, o_ref):
    # x_ref : (TB, dim_emb)        batch tile
    # w1_ref: (dim_emb, hp)        pre-transposed, hidden padded to lane multiple
    # b1_ref: (1, hp)
    # w2_ref: (hp, num_topic)      pre-transposed
    # b2_ref: (1, num_topic)
    # o_ref : (TB, num_topic)
    x = x_ref[...]

    # h = relu(x @ W1.T + b1)  (canonical contraction; hp lane-dense)
    h = jnp.dot(x, w1_ref[...], preferred_element_type=jnp.float32)
    h = jnp.maximum(h + b1_ref[...].astype(jnp.float32), 0.0)

    # y = h @ W2.T + b2
    y = jnp.dot(h.astype(w2_ref.dtype), w2_ref[...],
                preferred_element_type=jnp.float32)
    o_ref[...] = (y + b2_ref[...].astype(jnp.float32)).astype(o_ref.dtype)


def _pick_batch_tile(B, block_b):
    """Batch tile size: full B when small (block == array dim is always legal),
    otherwise a multiple of 8 capped at block_b and ~ceil(B/2) so the grid keeps
    at least 2 steps on the 'parallel' axis (v7x megacore / pipelining)."""
    if B <= 16:
        return B
    half = -(-B // 2)                 # ceil(B/2)
    tb = min(block_b, half)
    tb = ((tb + 7) // 8) * 8          # sublane-aligned
    return tb


def _classify_topic_tl_pallas(contextV, w1, b1, w2, b2, *, block_b=1024):
    """Fused Pallas path. contextV: (B, dim_emb); w1: (hidden, dim_emb);
    b1: (hidden,); w2: (num_topic, hidden); b2: (num_topic,)  (nn.Linear layout)."""
    B, dim_emb = contextV.shape
    hidden, dim_emb_w = w1.shape
    num_topic, hidden_w = w2.shape
    assert dim_emb == dim_emb_w and hidden == hidden_w
    assert b1.shape == (hidden,) and b2.shape == (num_topic,)

    # Pad hidden (10) up to a lane multiple (128): exact, makes h lane-dense and
    # the second matmul's contraction a clean MXU K.
    hp = ((hidden + 127) // 128) * 128
    if hp != hidden:
        w1 = jnp.pad(w1, ((0, hp - hidden), (0, 0)))
        b1 = jnp.pad(b1, (0, hp - hidden))
        w2 = jnp.pad(w2, ((0, 0), (0, hp - hidden)))

    # One-time (tiny) transposes so the in-kernel MXU feed is canonical.
    w1t = w1.T                      # (dim_emb, hp)
    w2t = w2.T                      # (hp, num_topic)
    b1_2d = b1.reshape(1, hp)
    b2_2d = b2.reshape(1, num_topic)

    tb = _pick_batch_tile(B, block_b)
    grid = (pl.cdiv(B, tb),)

    itemsize = jnp.dtype(contextV.dtype).itemsize
    cost = pl.CostEstimate(
        flops=2 * B * dim_emb * hp + 2 * B * hp * num_topic,
        transcendentals=0,
        bytes_accessed=(B * dim_emb + dim_emb * hp + hp
                        + hp * num_topic + num_topic + B * num_topic) * itemsize,
    )

    return pl.pallas_call(
        _mlp_kernel,
        out_shape=jax.ShapeDtypeStruct((B, num_topic), contextV.dtype),
        grid_spec=pltpu.PrefetchScalarGridSpec(
            num_scalar_prefetch=0,
            grid=grid,
            in_specs=[
                pl.BlockSpec((tb, dim_emb), lambda i: (i, 0)),       # x: batch-tiled
                pl.BlockSpec((dim_emb, hp), lambda i: (0, 0)),       # W1.T: resident
                pl.BlockSpec((1, hp), lambda i: (0, 0)),             # b1: resident
                pl.BlockSpec((hp, num_topic), lambda i: (0, 0)),     # W2.T: resident
                pl.BlockSpec((1, num_topic), lambda i: (0, 0)),      # b2: resident
            ],
            out_specs=pl.BlockSpec((tb, num_topic), lambda i: (i, 0)),
        ),
        compiler_params=pltpu.CompilerParams(
            dimension_semantics=("parallel",),   # independent batch tiles
        ),
        cost_estimate=cost,
    )(contextV, w1t, b1_2d, w2t, b2_2d)


def classify_topic_tl(contextV, w1, b1, w2, b2, *, block_b=1024, min_pallas_rows=256):
    """Dispatcher: tiny batches (the ~kFLOP deployment shape) skip pallas_call
    entirely — launch/DMA overhead would dominate by orders of magnitude."""
    B = contextV.shape[0]
    if B < min_pallas_rows:
        h = jnp.maximum(contextV @ w1.T + b1, 0.0)
        return h @ w2.T + b2
    return _classify_topic_tl_pallas(contextV, w1, b1, w2, b2, block_b=block_b)


def _reference(contextV, w1, b1, w2, b2):
    return jnp.maximum(contextV @ w1.T + b1, 0.0) @ w2.T + b2


if __name__ == "__main__":
    # Small shapes consistent with the module: dim_emb=32, num_topic=8, hidden fixed at 10.
    dim_emb, num_topic, hidden = 32, 8, 10

    key = jax.random.PRNGKey(0)
    kx, kw1, kb1, kw2, kb2, kx2 = jax.random.split(key, 6)

    # Deterministic init mimicking nn.Linear's uniform(-1/sqrt(fan_in), 1/sqrt(fan_in)).
    bound1 = 1.0 / (dim_emb ** 0.5)
    w1 = jax.random.uniform(kw1, (hidden, dim_emb), jnp.float32, -bound1, bound1)
    b1 = jax.random.uniform(kb1, (hidden,), jnp.float32, -bound1, bound1)

    bound2 = 1.0 / (hidden ** 0.5)
    w2 = jax.random.uniform(kw2, (num_topic, hidden), jnp.float32, -bound2, bound2)
    b2 = jax.random.uniform(kb2, (num_topic,), jnp.float32, -bound2, bound2)

    # 1) Pallas kernel at the deployment shape (forced, single full-batch tile).
    x_small = jax.random.normal(kx, (2, dim_emb), dtype=jnp.float32)
    out_small = _classify_topic_tl_pallas(x_small, w1, b1, w2, b2)
    jax.block_until_ready(out_small)
    ref_small = _reference(x_small, w1, b1, w2, b2)
    assert out_small.shape == (2, num_topic)
    assert jnp.allclose(out_small, ref_small, atol=1e-5, rtol=1e-5)

    # 2) Pallas kernel with a tiled batch (>= 2 grid steps on the 'parallel' axis).
    x_tiled = jax.random.normal(kx2, (64, dim_emb), dtype=jnp.float32)
    out_tiled = _classify_topic_tl_pallas(x_tiled, w1, b1, w2, b2)
    jax.block_until_ready(out_tiled)
    ref_tiled = _reference(x_tiled, w1, b1, w2, b2)
    assert out_tiled.shape == (64, num_topic)
    assert jnp.allclose(out_tiled, ref_tiled, atol=1e-5, rtol=1e-5)

    # 3) Dispatcher fast path at the tiny deployment batch (plain jnp, no pallas launch).
    out_fast = classify_topic_tl(x_small, w1, b1, w2, b2)
    jax.block_until_ready(out_fast)
    assert jnp.allclose(out_fast, ref_small, atol=1e-5, rtol=1e-5)

    print("KERNEL_OK")
</pallas_src>

<mosaic_0001>
module attributes {stable_mosaic.version = 11 : i64} {
  func.func @_mlp_kernel(%arg0: i32, %arg1: memref<2x32xf32, #tpu.memory_space<vmem>>, %arg2: memref<32x128xf32, #tpu.memory_space<vmem>>, %arg3: memref<1x128xf32, #tpu.memory_space<vmem>>, %arg4: memref<128x8xf32, #tpu.memory_space<vmem>>, %arg5: memref<1x8xf32, #tpu.memory_space<vmem>>, %arg6: memref<2x8xf32, #tpu.memory_space<vmem>>) attributes {dimension_semantics = [#tpu.dimension_semantics<parallel>], iteration_bounds = array<i64: 1>, scalar_prefetch = 0 : i64, scratch_operands = 0 : i64, tpu.core_type = #tpu.core_type<tc>, window_params = [{transform_indices = @transform_0, window_bounds = array<i64: 2, 32>}, {pipeline_mode = #tpu.pipeline_mode<synchronous>, transform_indices = @transform_1, window_bounds = array<i64: 32, 128>}, {pipeline_mode = #tpu.pipeline_mode<synchronous>, transform_indices = @transform_2, window_bounds = array<i64: 1, 128>}, {pipeline_mode = #tpu.pipeline_mode<synchronous>, transform_indices = @transform_3, window_bounds = array<i64: 128, 8>}, {pipeline_mode = #tpu.pipeline_mode<synchronous>, transform_indices = @transform_4, window_bounds = array<i64: 1, 8>}, {transform_indices = @transform_5, window_bounds = array<i64: 2, 8>}]} {
    %c0 = arith.constant 0 : index
    %c0_0 = arith.constant 0 : index
    %0 = vector.load %arg1[%c0, %c0_0] : memref<2x32xf32, #tpu.memory_space<vmem>>, vector<2x32xf32>
    %c0_1 = arith.constant 0 : index
    %c0_2 = arith.constant 0 : index
    %1 = vector.load %arg2[%c0_1, %c0_2] : memref<32x128xf32, #tpu.memory_space<vmem>>, vector<32x128xf32>
    %cst = arith.constant dense<0.000000e+00> : vector<2x128xf32>
    %2 = tpu.matmul %0, %1, %cst {dimension_numbers = #tpu.dot_dimension_numbers<[1], [0], [0], [1], [0, 0, 1, 1], [], []>} : vector<2x32xf32>, vector<32x128xf32>, vector<2x128xf32> -> vector<2x128xf32>
    %c0_3 = arith.constant 0 : index
    %c0_4 = arith.constant 0 : index
    %3 = vector.load %arg3[%c0_3, %c0_4] : memref<1x128xf32, #tpu.memory_space<vmem>>, vector<1x128xf32>
    %4 = vector.broadcast %3 : vector<1x128xf32> to vector<2x128xf32>
    %5 = arith.addf %2, %4 : vector<2x128xf32>
    %cst_5 = arith.constant 0.000000e+00 : f32
    %6 = vector.broadcast %cst_5 : f32 to vector<2x128xf32>
    %7 = arith.maximumf %5, %6 : vector<2x128xf32>
    %c0_6 = arith.constant 0 : index
    %c0_7 = arith.constant 0 : index
    %8 = vector.load %arg4[%c0_6, %c0_7] : memref<128x8xf32, #tpu.memory_space<vmem>>, vector<128x8xf32>
    %cst_8 = arith.constant dense<0.000000e+00> : vector<2x8xf32>
    %9 = tpu.matmul %7, %8, %cst_8 {dimension_numbers = #tpu.dot_dimension_numbers<[1], [0], [0], [1], [0, 0, 1, 1], [], []>} : vector<2x128xf32>, vector<128x8xf32>, vector<2x8xf32> -> vector<2x8xf32>
    %c0_9 = arith.constant 0 : index
    %c0_10 = arith.constant 0 : index
    %10 = vector.load %arg5[%c0_9, %c0_10] : memref<1x8xf32, #tpu.memory_space<vmem>>, vector<1x8xf32>
    %11 = vector.broadcast %10 : vector<1x8xf32> to vector<2x8xf32>
    %12 = arith.addf %9, %11 : vector<2x8xf32>
    %c0_11 = arith.constant 0 : index
    %c0_12 = arith.constant 0 : index
    %13 = vector.load %arg6[%c0_11, %c0_12] : memref<2x8xf32, #tpu.memory_space<vmem>>, vector<2x8xf32>
    tpu.vector_store %arg6[%c0_11, %c0_12], %12 {strides = array<i32>} : memref<2x8xf32, #tpu.memory_space<vmem>>, vector<2x8xf32>,
    return
  }
  func.func @transform_0(%arg0: i32) -> (i32, i32) {
    %c0_i32 = arith.constant 0 : i32
    %c0_i32_0 = arith.constant 0 : i32
    return %arg0, %c0_i32 : i32, i32
  }
  func.func @transform_1(%arg0: i32) -> (i32, i32) {
    %c0_i32 = arith.constant 0 : i32
    %c0_i32_0 = arith.constant 0 : i32
    %c0_i32_1 = arith.constant 0 : i32
    return %c0_i32, %c0_i32_0 : i32, i32
  }
  func.func @transform_2(%arg0: i32) -> (i32, i32) {
    %c0_i32 = arith.constant 0 : i32
    %c0_i32_0 = arith.constant 0 : i32
    %c0_i32_1 = arith.constant 0 : i32
    return %c0_i32, %c0_i32_0 : i32, i32
  }
  func.func @transform_3(%arg0: i32) -> (i32, i32) {
    %c0_i32 = arith.constant 0 : i32
    %c0_i32_0 = arith.constant 0 : i32
    %c0_i32_1 = arith.constant 0 : i32
    return %c0_i32, %c0_i32_0 : i32, i32
  }
  func.func @transform_4(%arg0: i32) -> (i32, i32) {
    %c0_i32 = arith.constant 0 : i32
    %c0_i32_0 = arith.constant 0 : i32
    %c0_i32_1 = arith.constant 0 : i32
    return %c0_i32, %c0_i32_0 : i32, i32
  }
  func.func @transform_5(%arg0: i32) -> (i32, i32) {
    %c0_i32 = arith.constant 0 : i32
    %c0_i32_0 = arith.constant 0 : i32
    return %arg0, %c0_i32 : i32, i32
  }
}

</mosaic_0001>

<bundles_post_ra>
// kernel: tpu_custom_call.1
= control target key start
LH: loop header
LB: loop body
LE: loop exit
PB: predicated region body
PF: predicated region fallthrough
CT: control target
= control target key end

     0   :  { %vm30_vm0 = vcmask 261120   ;;  %s246_s0 = inlined_call_operand.vmem [shape: f32[2,32], index: 0, kind: input, shape index: {}]   ;;  %s247_s1 = inlined_call_operand.vmem [shape: f32[32,128], index: 1, kind: input, shape index: {}]   ;;  %s248_s2 = inlined_call_operand.vmem [shape: f32[1,128], index: 2, kind: input, shape index: {}]   ;;  %s249_s3 = inlined_call_operand.vmem [shape: f32[128,8], index: 3, kind: input, shape index: {}]   ;;  %s250_s4 = inlined_call_operand.vmem [shape: f32[1,8], index: 4, kind: input, shape index: {}]   ;;  %s251_s5 = inlined_call_operand.hbm [shape: f32[2,8], index: 5, kind: output, shape index: {}]  }
   0x1   :  { %v25_v0 = vld [vmem:[%s247_s1 + $0x18] sm:$0xff]  ;;  %v24_v1 = vld [vmem:[%s247_s1 + $0x10] sm:$0xff]  ;;  %v23_v3 = vld [vmem:[%s247_s1 + $0x8] sm:$0xff] }
   0x2   :  { %46 = vmatpush.msra.mxu0 %v25_v0  ;;  %v70_v2 = vld [vmem:[%s249_s3 + $0x78] sm:$0xff]  ;;  %v69_v4 = vld [vmem:[%s249_s3 + $0x70] sm:$0xff]  ;;  %v68_v5 = vld [vmem:[%s249_s3 + $0x68] sm:$0xff] }
   0x3   :  { %75 = vmatpush.msra.mxu1 %v70_v2  ;;  %v22_v6 = vld [vmem:[%s247_s1] sm:$0xff]  ;;  %v66_v9 = vld [vmem:[%s249_s3 + $0x58] sm:$0xff] }
   0x4   :  { %47 = vmatpush.msra.mxu0 %v24_v1  ;;  %v21_v7 = vld [vmem:[%s246_s0] sm:$0x3] }
   0x5   :  { %76 = vmatpush.msra.mxu1 %v69_v4  ;;  %v67_v8 = vld [vmem:[%s249_s3 + $0x60] sm:$0xff] }
   0x6   :  { %48 = vmatpush.msra.mxu0 %v23_v3 }
   0x7   :  { %77 = vmatpush.msra.mxu1 %v68_v5 }
   0x8   :  { %49 = vmatpush.msra.mxu0 %v22_v6 }
   0x9   :  { %10 = vsyncpa [#allocation3], 0  ;;  %113 = vmatmul.msk.f32.vlgmr.msra.gmra.mxu0 %vm30_vm0, %v21_v7  ;;  %78 = vmatpush.msra.mxu1 %v67_v8  ;;  %v65_v10 = vld [vmem:[%s249_s3 + $0x50] sm:$0xff]  ;;  %v64_v11 = vld [vmem:[%s249_s3 + $0x48] sm:$0xff]  ;;  %s143_s12 = smov [#allocation2]   ;;  %s104_s14 = sshll.u32 %s251_s5, 4  ;;  %s105_s14 = int_to_ptr.hbm [resolvable:$true] %s104_s14 }
   0xa   :  { %v63_v12 = vld [vmem:[%s249_s3 + $0x40] sm:$0xff]  ;;  %v62_v13 = vld [vmem:[%s249_s3 + $0x38] sm:$0xff]  ;;  %v61_v14 = vld [vmem:[%s249_s3 + $0x30] sm:$0xff]  ;;  %s102_s1 = sshll.u32 %s143_s12, 4  ;;  %vm95_vm1 = vcmask 58368   ;;  %s103_s1 = int_to_ptr.vmem [resolvable:$true] %s102_s1 }
   0xb   :  { %79 = vmatpush.msra.mxu1 %v66_v9  ;;  %v60_v15 = vld [vmem:[%s249_s3 + $0x28] sm:$0xff]  ;;  %v59_v16 = vld [vmem:[%s249_s3 + $0x20] sm:$0xff]  ;;  %v58_v17 = vld [vmem:[%s249_s3 + $0x18] sm:$0xff] }
   0xc   :  { %v57_v18 = vld [vmem:[%s249_s3 + $0x10] sm:$0xff]  ;;  %v56_v19 = vld [vmem:[%s249_s3 + $0x8] sm:$0xff]  ;;  %v55_v20 = vld [vmem:[%s249_s3] sm:$0xff] }
   0xd   :  { %80 = vmatpush.msra.mxu1 %v65_v10  ;;  %v115_v21 = vld [vmem:[%s248_s2] ss:$0 sm:$0xff] }
   0xe   :  { %v116_v25 = vld [vmem:[%s250_s4] ss:$0 sm:$0xff] }
   0xf   :  { %81 = vmatpush.msra.mxu1 %v64_v11 }
  0x11   :  { %82 = vmatpush.msra.mxu1 %v63_v12 }
  0x13   :  { %83 = vmatpush.msra.mxu1 %v62_v13 }
  0x15   :  { %84 = vmatpush.msra.mxu1 %v61_v14 }
  0x17   :  { %85 = vmatpush.msra.mxu1 %v60_v15 }
  0x19   :  { %86 = vmatpush.msra.mxu1 %v59_v16 }
  0x1b   :  { %87 = vmatpush.msra.mxu1 %v58_v17 }
  0x1d   :  { %88 = vmatpush.msra.mxu1 %v57_v18 }
  0x1f   :  { %89 = vmatpush.msra.mxu1 %v56_v19 }
  0x21   :  { %90 = vmatpush.msra.mxu1 %v55_v20 }
  0x86   :  { %v51_v22 = vpop.f32.mrf.mxu0 }
  0x87   :  { %v52_v23 = vadd.f32 %v115_v21, %v51_v22 }
  0x89   :  { %v54_v24 = vmax.f32 %v52_v23, 0.0 }
  0x8b   :  { %91 = vmatmul.f32.vlgmr.msra.gmra.mxu1 %v54_v24 }
 0x108   :  { %v92_v26 = vpop.f32.mrf.mxu1 }
 0x109   :  { %v93_v27 = vadd.f32 %v116_v25, %v92_v26 }
 0x10b   :  { %96 = vst.msk [vmem:[#allocation2] sm:$0x3] %vm95_vm1, %v93_v27 }
 0x10c   :  { %107 = dma.vmem_to_hbm [thread:$0]  %s103_s1, 32, %s105_s14, [#allocation3]  }
 0x10d   :  { %141 = dma.done.wait [#allocation3], 32  }
 0x10e   :  { %142 = vsyncadd [#allocation3], 4294967264 }
 0x10f   :  { %112 = vsyncpa [#allocation3], 1 }

</bundles_post_ra>
